<compile_context>
chip_gen: v6e
topology: v6e:2x2x1
jax: 0.10.0
libtpu: 0.0.40
codegen_flags: <defaults>
</compile_context>

<pallas_src>
from functools import partial

import jax
import jax.numpy as jnp
from jax import lax
from jax.experimental import pallas as pl
from jax.experimental.pallas import tpu as pltpu


def _make_kernel(D, M, n_ctrl, RC, chunks):
    """Kernel over one (Bt, ...) batch block, processed in RC-row chunks."""

    def kernel(tau_ref, slew_ref, ctrue_ref, cvec_ref, out_ref):
        # tau_ref:   (Bt, D)       slew_ref: (Bt, D*D)   (t=0 slab, flattened)
        # ctrue_ref: (Bt, M*M)     cvec_ref: (Bt, M)     out_ref: (Bt, 1)
        def chunk(ci, carry):
            r0 = pl.multiple_of(ci * RC, RC)
            rows = pl.ds(r0, RC)

            tau_c = tau_ref[rows, :].astype(jnp.float32)          # (RC, D)
            ttau_c = tau_c[:, n_ctrl:]                            # (RC, M)

            # --- true cost:  w_true = 0.5 * (C_true^T ttau) + c_true ---
            ct = ctrue_ref[rows, :].astype(jnp.float32)           # (RC, M*M)
            pt = ct[:, 0:M] * ttau_c[:, 0:1]
            for i in range(1, M):                                 # static unroll
                pt = pt + ct[:, i * M:(i + 1) * M] * ttau_c[:, i:i + 1]
            w_true = 0.5 * pt + cvec_ref[rows, :].astype(jnp.float32)  # (RC, M)

            # --- slew cost:  p = slew_C0^T tau  (per row) ---
            cs = slew_ref[rows, :].astype(jnp.float32)            # (RC, D*D)
            p = cs[:, 0:D] * tau_c[:, 0:1]
            for i in range(1, D):                                 # static unroll
                p = p + cs[:, i * D:(i + 1) * D] * tau_c[:, i:i + 1]

            # Only two cross-lane reduces per chunk; 0.5 applied once.
            out_c = (0.5 * jnp.sum(p * tau_c, axis=1, keepdims=True)
                     + jnp.sum(w_true * ttau_c, axis=1, keepdims=True))
            out_ref[rows, :] = out_c                              # (RC, 1)
            return carry

        lax.fori_loop(0, chunks, chunk, 0)

    return kernel


@partial(jax.jit, static_argnames=("n_ctrl",))
def slew_rate_cost(tau, C_true, c_true, slew_C, n_ctrl):
    """Pallas forward of SlewRateCost. Returns shape (B,) float32.

    tau: (B, D) with D = n_state + 2*n_ctrl; C_true: (B, M, M), c_true: (B, M)
    with M = D - n_ctrl; slew_C: (T, B, D, D) (only slew_C[0] is used).
    Assumes the wrapped `cost` is QuadCost-style (0.5 z^T C z + c.z).
    """
    B, D = tau.shape
    M = D - n_ctrl
    T = slew_C.shape[0]
    assert C_true.shape == (B, M, M) and c_true.shape == (B, M)
    assert slew_C.shape[1:] == (B, D, D)
    DD, MM = D * D, M * M

    # Free (layout-preserving) reshapes only -- no HBM relayout of C operands.
    slew_flat = slew_C.reshape(T, B, DD)      # trailing-dim merge: bitcast
    ctrue_flat = C_true.reshape(B, MM)

    # Batch tile: multiple of 64 (so RC=32 divides it), capped at 512 rows,
    # sized so grid >= 2 once B > 64 (both v7x TensorCores get work).
    if B <= 64:
        Bt, RC = B, B
    else:
        Bt = 64 * max(1, min(8, pl.cdiv(B, 128)))
        RC = 32
    chunks = Bt // RC
    grid = (pl.cdiv(B, Bt),)

    bytes_accessed = int(B * (DD * slew_C.dtype.itemsize
                              + MM * C_true.dtype.itemsize
                              + D * tau.dtype.itemsize
                              + M * c_true.dtype.itemsize + 4))
    cost = pl.CostEstimate(flops=int(2 * B * (DD + MM + D + 2 * M)),
                           transcendentals=0,
                           bytes_accessed=bytes_accessed)

    kernel = _make_kernel(D, M, n_ctrl, RC, chunks)

    out = pl.pallas_call(
        kernel,
        out_shape=jax.ShapeDtypeStruct((B, 1), jnp.float32),
        grid_spec=pltpu.PrefetchScalarGridSpec(
            num_scalar_prefetch=0,
            grid=grid,
            in_specs=[
                pl.BlockSpec((Bt, D), lambda b: (b, 0)),            # tau
                pl.BlockSpec((None, Bt, DD), lambda b: (0, b, 0)),  # slew_C (t=0 slab only)
                pl.BlockSpec((Bt, MM), lambda b: (b, 0)),           # C_true (flat)
                pl.BlockSpec((Bt, M), lambda b: (b, 0)),            # c_true
            ],
            out_specs=pl.BlockSpec((Bt, 1), lambda b: (b, 0)),
        ),
        compiler_params=pltpu.CompilerParams(
            dimension_semantics=("parallel",),                      # megacore / v7x 2-TC
        ),
        cost_estimate=cost,
    )(tau, slew_flat, ctrue_flat, c_true)

    return out[:, 0]


def _reference(tau, C_true, c_true, slew_C, n_ctrl):
    true_tau = tau[:, n_ctrl:]
    qt = jnp.einsum("bi,bij,bj->b", true_tau, C_true, true_tau, precision="highest")
    true_cost = 0.5 * qt + jnp.sum(c_true * true_tau, axis=-1)
    qs = jnp.einsum("bi,bij,bj->b", tau, slew_C[0], tau, precision="highest")
    return true_cost + 0.5 * qs


def _make_inputs(key, B, T, D, M):
    k1, k2, k3, k4 = jax.random.split(key, 4)
    tau = jax.random.normal(k1, (B, D), dtype=jnp.float32)
    A = jax.random.normal(k2, (B, M, M), dtype=jnp.float32)
    C_true = 0.1 * jnp.einsum("bik,bjk->bij", A, A)          # PSD, symmetric
    c_true = jax.random.normal(k3, (B, M), dtype=jnp.float32)
    S = jax.random.normal(k4, (T, B, D, D), dtype=jnp.float32)
    slew_C = 0.1 * jnp.einsum("tbik,tbjk->tbij", S, S)       # (T, B, D, D)
    return tau, C_true, c_true, slew_C


if __name__ == "__main__":
    n_state, n_ctrl, T = 8, 4, 3
    D = n_state + 2 * n_ctrl          # augmented tau dim: [u_prev, x, u] = 16
    M = n_state + n_ctrl              # true tau dim:      [x, u]         = 12

    # Small shape consistent with the module.
    B = 2
    tau, C_true, c_true, slew_C = _make_inputs(jax.random.PRNGKey(0), B, T, D, M)
    out = jax.block_until_ready(
        slew_rate_cost(tau, C_true, c_true, slew_C, n_ctrl=n_ctrl))
    ref = _reference(tau, C_true, c_true, slew_C, n_ctrl)
    assert out.shape == (B,)
    assert jnp.allclose(out, ref, rtol=2e-3, atol=2e-3), (out, ref)

    # Also exercise the multi-block / partial-final-block path (B > 64).
    B2 = 100
    tau2, C_true2, c_true2, slew_C2 = _make_inputs(jax.random.PRNGKey(1), B2, T, D, M)
    out2 = jax.block_until_ready(
        slew_rate_cost(tau2, C_true2, c_true2, slew_C2, n_ctrl=n_ctrl))
    ref2 = _reference(tau2, C_true2, c_true2, slew_C2, n_ctrl)
    assert out2.shape == (B2,)
    assert jnp.allclose(out2, ref2, rtol=2e-3, atol=2e-3), (out2, ref2)

    # TODO(synk): grad_input raises NotImplementedError in the original module; not translated.
    print("KERNEL_OK")
</pallas_src>

<mosaic_0001>
module attributes {stable_mosaic.version = 11 : i64} {
  func.func @kernel(%arg0: i32, %arg1: memref<2x16xf32, #tpu.memory_space<vmem>>, %arg2: memref<1x2x256xf32, #tpu.memory_space<vmem>>, %arg3: memref<2x144xf32, #tpu.memory_space<vmem>>, %arg4: memref<2x12xf32, #tpu.memory_space<vmem>>, %arg5: memref<2x1xf32, #tpu.memory_space<vmem>>) attributes {dimension_semantics = [#tpu.dimension_semantics<parallel>], iteration_bounds = array<i64: 1>, scalar_prefetch = 0 : i64, scratch_operands = 0 : i64, tpu.core_type = #tpu.core_type<tc>, window_params = [{transform_indices = @transform_0, window_bounds = array<i64: 2, 16>}, {transform_indices = @transform_1, window_bounds = array<i64: 1, 2, 256>}, {transform_indices = @transform_2, window_bounds = array<i64: 2, 144>}, {transform_indices = @transform_3, window_bounds = array<i64: 2, 12>}, {transform_indices = @transform_4, window_bounds = array<i64: 2, 1>}]} {
    %c0_i32 = arith.constant 0 : i32
    %c2_i32 = arith.constant 2 : i32
    %0 = arith.muli %c0_i32, %c2_i32 : i32
    %1 = tpu.assume_multiple %0, 2 : i32
    %2 = arith.index_cast %1 : i32 to index
    %c0 = arith.constant 0 : index
    %3 = vector.load %arg1[%2, %c0] : memref<2x16xf32, #tpu.memory_space<vmem>>, vector<2x16xf32>
    %4 = vector.extract_strided_slice %3 {offsets = [0, 4], sizes = [2, 12], strides = [1, 1]} : vector<2x16xf32> to vector<2x12xf32>
    %5 = arith.index_cast %1 : i32 to index
    %c0_0 = arith.constant 0 : index
    %6 = vector.load %arg3[%5, %c0_0] : memref<2x144xf32, #tpu.memory_space<vmem>>, vector<2x144xf32>
    %7 = vector.extract_strided_slice %6 {offsets = [0, 0], sizes = [2, 12], strides = [1, 1]} : vector<2x144xf32> to vector<2x12xf32>
    %8 = vector.extract_strided_slice %4 {offsets = [0, 0], sizes = [2, 1], strides = [1, 1]} : vector<2x12xf32> to vector<2x1xf32>
    %9 = vector.broadcast %8 : vector<2x1xf32> to vector<2x12xf32>
    %10 = arith.mulf %7, %9 : vector<2x12xf32>
    %11 = vector.extract_strided_slice %6 {offsets = [0, 12], sizes = [2, 12], strides = [1, 1]} : vector<2x144xf32> to vector<2x12xf32>
    %12 = vector.extract_strided_slice %4 {offsets = [0, 1], sizes = [2, 1], strides = [1, 1]} : vector<2x12xf32> to vector<2x1xf32>
    %13 = vector.broadcast %12 : vector<2x1xf32> to vector<2x12xf32>
    %14 = arith.mulf %11, %13 : vector<2x12xf32>
    %15 = arith.addf %10, %14 : vector<2x12xf32>
    %16 = vector.extract_strided_slice %6 {offsets = [0, 24], sizes = [2, 12], strides = [1, 1]} : vector<2x144xf32> to vector<2x12xf32>
    %17 = vector.extract_strided_slice %4 {offsets = [0, 2], sizes = [2, 1], strides = [1, 1]} : vector<2x12xf32> to vector<2x1xf32>
    %18 = vector.broadcast %17 : vector<2x1xf32> to vector<2x12xf32>
    %19 = arith.mulf %16, %18 : vector<2x12xf32>
    %20 = arith.addf %15, %19 : vector<2x12xf32>
    %21 = vector.extract_strided_slice %6 {offsets = [0, 36], sizes = [2, 12], strides = [1, 1]} : vector<2x144xf32> to vector<2x12xf32>
    %22 = vector.extract_strided_slice %4 {offsets = [0, 3], sizes = [2, 1], strides = [1, 1]} : vector<2x12xf32> to vector<2x1xf32>
    %23 = vector.broadcast %22 : vector<2x1xf32> to vector<2x12xf32>
    %24 = arith.mulf %21, %23 : vector<2x12xf32>
    %25 = arith.addf %20, %24 : vector<2x12xf32>
    %26 = vector.extract_strided_slice %6 {offsets = [0, 48], sizes = [2, 12], strides = [1, 1]} : vector<2x144xf32> to vector<2x12xf32>
    %27 = vector.extract_strided_slice %4 {offsets = [0, 4], sizes = [2, 1], strides = [1, 1]} : vector<2x12xf32> to vector<2x1xf32>
    %28 = vector.broadcast %27 : vector<2x1xf32> to vector<2x12xf32>
    %29 = arith.mulf %26, %28 : vector<2x12xf32>
    %30 = arith.addf %25, %29 : vector<2x12xf32>
    %31 = vector.extract_strided_slice %6 {offsets = [0, 60], sizes = [2, 12], strides = [1, 1]} : vector<2x144xf32> to vector<2x12xf32>
    %32 = vector.extract_strided_slice %4 {offsets = [0, 5], sizes = [2, 1], strides = [1, 1]} : vector<2x12xf32> to vector<2x1xf32>
    %33 = vector.broadcast %32 : vector<2x1xf32> to vector<2x12xf32>
    %34 = arith.mulf %31, %33 : vector<2x12xf32>
    %35 = arith.addf %30, %34 : vector<2x12xf32>
    %36 = vector.extract_strided_slice %6 {offsets = [0, 72], sizes = [2, 12], strides = [1, 1]} : vector<2x144xf32> to vector<2x12xf32>
    %37 = vector.extract_strided_slice %4 {offsets = [0, 6], sizes = [2, 1], strides = [1, 1]} : vector<2x12xf32> to vector<2x1xf32>
    %38 = vector.broadcast %37 : vector<2x1xf32> to vector<2x12xf32>
    %39 = arith.mulf %36, %38 : vector<2x12xf32>
    %40 = arith.addf %35, %39 : vector<2x12xf32>
    %41 = vector.extract_strided_slice %6 {offsets = [0, 84], sizes = [2, 12], strides = [1, 1]} : vector<2x144xf32> to vector<2x12xf32>
    %42 = vector.extract_strided_slice %4 {offsets = [0, 7], sizes = [2, 1], strides = [1, 1]} : vector<2x12xf32> to vector<2x1xf32>
    %43 = vector.broadcast %42 : vector<2x1xf32> to vector<2x12xf32>
    %44 = arith.mulf %41, %43 : vector<2x12xf32>
    %45 = arith.addf %40, %44 : vector<2x12xf32>
    %46 = vector.extract_strided_slice %6 {offsets = [0, 96], sizes = [2, 12], strides = [1, 1]} : vector<2x144xf32> to vector<2x12xf32>
    %47 = vector.extract_strided_slice %4 {offsets = [0, 8], sizes = [2, 1], strides = [1, 1]} : vector<2x12xf32> to vector<2x1xf32>
    %48 = vector.broadcast %47 : vector<2x1xf32> to vector<2x12xf32>
    %49 = arith.mulf %46, %48 : vector<2x12xf32>
    %50 = arith.addf %45, %49 : vector<2x12xf32>
    %51 = vector.extract_strided_slice %6 {offsets = [0, 108], sizes = [2, 12], strides = [1, 1]} : vector<2x144xf32> to vector<2x12xf32>
    %52 = vector.extract_strided_slice %4 {offsets = [0, 9], sizes = [2, 1], strides = [1, 1]} : vector<2x12xf32> to vector<2x1xf32>
    %53 = vector.broadcast %52 : vector<2x1xf32> to vector<2x12xf32>
    %54 = arith.mulf %51, %53 : vector<2x12xf32>
    %55 = arith.addf %50, %54 : vector<2x12xf32>
    %56 = vector.extract_strided_slice %6 {offsets = [0, 120], sizes = [2, 12], strides = [1, 1]} : vector<2x144xf32> to vector<2x12xf32>
    %57 = vector.extract_strided_slice %4 {offsets = [0, 10], sizes = [2, 1], strides = [1, 1]} : vector<2x12xf32> to vector<2x1xf32>
    %58 = vector.broadcast %57 : vector<2x1xf32> to vector<2x12xf32>
    %59 = arith.mulf %56, %58 : vector<2x12xf32>
    %60 = arith.addf %55, %59 : vector<2x12xf32>
    %61 = vector.extract_strided_slice %6 {offsets = [0, 132], sizes = [2, 12], strides = [1, 1]} : vector<2x144xf32> to vector<2x12xf32>
    %62 = vector.extract_strided_slice %4 {offsets = [0, 11], sizes = [2, 1], strides = [1, 1]} : vector<2x12xf32> to vector<2x1xf32>
    %63 = vector.broadcast %62 : vector<2x1xf32> to vector<2x12xf32>
    %64 = arith.mulf %61, %63 : vector<2x12xf32>
    %65 = arith.addf %60, %64 : vector<2x12xf32>
    %cst = arith.constant 5.000000e-01 : f32
    %66 = vector.broadcast %cst : f32 to vector<2x12xf32>
    %67 = arith.mulf %66, %65 : vector<2x12xf32>
    %68 = arith.index_cast %1 : i32 to index
    %c0_1 = arith.constant 0 : index
    %69 = vector.load %arg4[%68, %c0_1] : memref<2x12xf32, #tpu.memory_space<vmem>>, vector<2x12xf32>
    %70 = arith.addf %67, %69 : vector<2x12xf32>
    %c0_2 = arith.constant 0 : index
    %71 = arith.index_cast %1 : i32 to index
    %c0_3 = arith.constant 0 : index
    %72 = vector.load %arg2[%c0_2, %71, %c0_3] : memref<1x2x256xf32, #tpu.memory_space<vmem>>, vector<1x2x256xf32>
    %73 = vector.shape_cast %72 : vector<1x2x256xf32> to vector<2x256xf32>
    %74 = vector.extract_strided_slice %73 {offsets = [0, 0], sizes = [2, 16], strides = [1, 1]} : vector<2x256xf32> to vector<2x16xf32>
    %75 = vector.extract_strided_slice %3 {offsets = [0, 0], sizes = [2, 1], strides = [1, 1]} : vector<2x16xf32> to vector<2x1xf32>
    %76 = vector.broadcast %75 : vector<2x1xf32> to vector<2x16xf32>
    %77 = arith.mulf %74, %76 : vector<2x16xf32>
    %78 = vector.extract_strided_slice %73 {offsets = [0, 16], sizes = [2, 16], strides = [1, 1]} : vector<2x256xf32> to vector<2x16xf32>
    %79 = vector.extract_strided_slice %3 {offsets = [0, 1], sizes = [2, 1], strides = [1, 1]} : vector<2x16xf32> to vector<2x1xf32>
    %80 = vector.broadcast %79 : vector<2x1xf32> to vector<2x16xf32>
    %81 = arith.mulf %78, %80 : vector<2x16xf32>
    %82 = arith.addf %77, %81 : vector<2x16xf32>
    %83 = vector.extract_strided_slice %73 {offsets = [0, 32], sizes = [2, 16], strides = [1, 1]} : vector<2x256xf32> to vector<2x16xf32>
    %84 = vector.extract_strided_slice %3 {offsets = [0, 2], sizes = [2, 1], strides = [1, 1]} : vector<2x16xf32> to vector<2x1xf32>
    %85 = vector.broadcast %84 : vector<2x1xf32> to vector<2x16xf32>
    %86 = arith.mulf %83, %85 : vector<2x16xf32>
    %87 = arith.addf %82, %86 : vector<2x16xf32>
    %88 = vector.extract_strided_slice %73 {offsets = [0, 48], sizes = [2, 16], strides = [1, 1]} : vector<2x256xf32> to vector<2x16xf32>
    %89 = vector.extract_strided_slice %3 {offsets = [0, 3], sizes = [2, 1], strides = [1, 1]} : vector<2x16xf32> to vector<2x1xf32>
    %90 = vector.broadcast %89 : vector<2x1xf32> to vector<2x16xf32>
    %91 = arith.mulf %88, %90 : vector<2x16xf32>
    %92 = arith.addf %87, %91 : vector<2x16xf32>
    %93 = vector.extract_strided_slice %73 {offsets = [0, 64], sizes = [2, 16], strides = [1, 1]} : vector<2x256xf32> to vector<2x16xf32>
    %94 = vector.extract_strided_slice %3 {offsets = [0, 4], sizes = [2, 1], strides = [1, 1]} : vector<2x16xf32> to vector<2x1xf32>
    %95 = vector.broadcast %94 : vector<2x1xf32> to vector<2x16xf32>
    %96 = arith.mulf %93, %95 : vector<2x16xf32>
    %97 = arith.addf %92, %96 : vector<2x16xf32>
    %98 = vector.extract_strided_slice %73 {offsets = [0, 80], sizes = [2, 16], strides = [1, 1]} : vector<2x256xf32> to vector<2x16xf32>
    %99 = vector.extract_strided_slice %3 {offsets = [0, 5], sizes = [2, 1], strides = [1, 1]} : vector<2x16xf32> to vector<2x1xf32>
    %100 = vector.broadcast %99 : vector<2x1xf32> to vector<2x16xf32>
    %101 = arith.mulf %98, %100 : vector<2x16xf32>
    %102 = arith.addf %97, %101 : vector<2x16xf32>
    %103 = vector.extract_strided_slice %73 {offsets = [0, 96], sizes = [2, 16], strides = [1, 1]} : vector<2x256xf32> to vector<2x16xf32>
    %104 = vector.extract_strided_slice %3 {offsets = [0, 6], sizes = [2, 1], strides = [1, 1]} : vector<2x16xf32> to vector<2x1xf32>
    %105 = vector.broadcast %104 : vector<2x1xf32> to vector<2x16xf32>
    %106 = arith.mulf %103, %105 : vector<2x16xf32>
    %107 = arith.addf %102, %106 : vector<2x16xf32>
    %108 = vector.extract_strided_slice %73 {offsets = [0, 112], sizes = [2, 16], strides = [1, 1]} : vector<2x256xf32> to vector<2x16xf32>
    %109 = vector.extract_strided_slice %3 {offsets = [0, 7], sizes = [2, 1], strides = [1, 1]} : vector<2x16xf32> to vector<2x1xf32>
    %110 = vector.broadcast %109 : vector<2x1xf32> to vector<2x16xf32>
    %111 = arith.mulf %108, %110 : vector<2x16xf32>
    %112 = arith.addf %107, %111 : vector<2x16xf32>
    %113 = vector.extract_strided_slice %73 {offsets = [0, 128], sizes = [2, 16], strides = [1, 1]} : vector<2x256xf32> to vector<2x16xf32>
    %114 = vector.extract_strided_slice %3 {offsets = [0, 8], sizes = [2, 1], strides = [1, 1]} : vector<2x16xf32> to vector<2x1xf32>
    %115 = vector.broadcast %114 : vector<2x1xf32> to vector<2x16xf32>
    %116 = arith.mulf %113, %115 : vector<2x16xf32>
    %117 = arith.addf %112, %116 : vector<2x16xf32>
    %118 = vector.extract_strided_slice %73 {offsets = [0, 144], sizes = [2, 16], strides = [1, 1]} : vector<2x256xf32> to vector<2x16xf32>
    %119 = vector.extract_strided_slice %3 {offsets = [0, 9], sizes = [2, 1], strides = [1, 1]} : vector<2x16xf32> to vector<2x1xf32>
    %120 = vector.broadcast %119 : vector<2x1xf32> to vector<2x16xf32>
    %121 = arith.mulf %118, %120 : vector<2x16xf32>
    %122 = arith.addf %117, %121 : vector<2x16xf32>
    %123 = vector.extract_strided_slice %73 {offsets = [0, 160], sizes = [2, 16], strides = [1, 1]} : vector<2x256xf32> to vector<2x16xf32>
    %124 = vector.extract_strided_slice %3 {offsets = [0, 10], sizes = [2, 1], strides = [1, 1]} : vector<2x16xf32> to vector<2x1xf32>
    %125 = vector.broadcast %124 : vector<2x1xf32> to vector<2x16xf32>
    %126 = arith.mulf %123, %125 : vector<2x16xf32>
    %127 = arith.addf %122, %126 : vector<2x16xf32>
    %128 = vector.extract_strided_slice %73 {offsets = [0, 176], sizes = [2, 16], strides = [1, 1]} : vector<2x256xf32> to vector<2x16xf32>
    %129 = vector.extract_strided_slice %3 {offsets = [0, 11], sizes = [2, 1], strides = [1, 1]} : vector<2x16xf32> to vector<2x1xf32>
    %130 = vector.broadcast %129 : vector<2x1xf32> to vector<2x16xf32>
    %131 = arith.mulf %128, %130 : vector<2x16xf32>
    %132 = arith.addf %127, %131 : vector<2x16xf32>
    %133 = vector.extract_strided_slice %73 {offsets = [0, 192], sizes = [2, 16], strides = [1, 1]} : vector<2x256xf32> to vector<2x16xf32>
    %134 = vector.extract_strided_slice %3 {offsets = [0, 12], sizes = [2, 1], strides = [1, 1]} : vector<2x16xf32> to vector<2x1xf32>
    %135 = vector.broadcast %134 : vector<2x1xf32> to vector<2x16xf32>
    %136 = arith.mulf %133, %135 : vector<2x16xf32>
    %137 = arith.addf %132, %136 : vector<2x16xf32>
    %138 = vector.extract_strided_slice %73 {offsets = [0, 208], sizes = [2, 16], strides = [1, 1]} : vector<2x256xf32> to vector<2x16xf32>
    %139 = vector.extract_strided_slice %3 {offsets = [0, 13], sizes = [2, 1], strides = [1, 1]} : vector<2x16xf32> to vector<2x1xf32>
    %140 = vector.broadcast %139 : vector<2x1xf32> to vector<2x16xf32>
    %141 = arith.mulf %138, %140 : vector<2x16xf32>
    %142 = arith.addf %137, %141 : vector<2x16xf32>
    %143 = vector.extract_strided_slice %73 {offsets = [0, 224], sizes = [2, 16], strides = [1, 1]} : vector<2x256xf32> to vector<2x16xf32>
    %144 = vector.extract_strided_slice %3 {offsets = [0, 14], sizes = [2, 1], strides = [1, 1]} : vector<2x16xf32> to vector<2x1xf32>
    %145 = vector.broadcast %144 : vector<2x1xf32> to vector<2x16xf32>
    %146 = arith.mulf %143, %145 : vector<2x16xf32>
    %147 = arith.addf %142, %146 : vector<2x16xf32>
    %148 = vector.extract_strided_slice %73 {offsets = [0, 240], sizes = [2, 16], strides = [1, 1]} : vector<2x256xf32> to vector<2x16xf32>
    %149 = vector.extract_strided_slice %3 {offsets = [0, 15], sizes = [2, 1], strides = [1, 1]} : vector<2x16xf32> to vector<2x1xf32>
    %150 = vector.broadcast %149 : vector<2x1xf32> to vector<2x16xf32>
    %151 = arith.mulf %148, %150 : vector<2x16xf32>
    %152 = arith.addf %147, %151 : vector<2x16xf32>
    %153 = arith.mulf %152, %3 : vector<2x16xf32>
    %cst_4 = arith.constant dense<0.000000e+00> : vector<2xf32>
    %154 = vector.multi_reduction <add>, %153, %cst_4 [1] : vector<2x16xf32> to vector<2xf32>
    %155 = vector.shape_cast %154 : vector<2xf32> to vector<2x1xf32>
    %cst_5 = arith.constant 5.000000e-01 : f32
    %156 = vector.broadcast %cst_5 : f32 to vector<2x1xf32>
    %157 = arith.mulf %156, %155 : vector<2x1xf32>
    %158 = arith.mulf %70, %4 : vector<2x12xf32>
    %cst_6 = arith.constant dense<0.000000e+00> : vector<2xf32>
    %159 = vector.multi_reduction <add>, %158, %cst_6 [1] : vector<2x12xf32> to vector<2xf32>
    %160 = vector.shape_cast %159 : vector<2xf32> to vector<2x1xf32>
    %161 = arith.addf %157, %160 : vector<2x1xf32>
    %162 = arith.index_cast %1 : i32 to index
    %c0_7 = arith.constant 0 : index
    %163 = vector.load %arg5[%162, %c0_7] : memref<2x1xf32, #tpu.memory_space<vmem>>, vector<2x1xf32>
    tpu.vector_store %arg5[%162, %c0_7], %161 {strides = array<i32>} : memref<2x1xf32, #tpu.memory_space<vmem>>, vector<2x1xf32>,
    %c1_i32 = arith.constant 1 : i32
    return
  }
  func.func @transform_0(%arg0: i32) -> (i32, i32) {
    %c0_i32 = arith.constant 0 : i32
    %c0_i32_0 = arith.constant 0 : i32
    return %arg0, %c0_i32 : i32, i32
  }
  func.func @transform_1(%arg0: i32) -> (i32, i32, i32) {
    %c0_i32 = arith.constant 0 : i32
    %c0_i32_0 = arith.constant 0 : i32
    %c0_i32_1 = arith.constant 0 : i32
    return %c0_i32, %arg0, %c0_i32_0 : i32, i32, i32
  }
  func.func @transform_2(%arg0: i32) -> (i32, i32) {
    %c0_i32 = arith.constant 0 : i32
    %c0_i32_0 = arith.constant 0 : i32
    return %arg0, %c0_i32 : i32, i32
  }
  func.func @transform_3(%arg0: i32) -> (i32, i32) {
    %c0_i32 = arith.constant 0 : i32
    %c0_i32_0 = arith.constant 0 : i32
    return %arg0, %c0_i32 : i32, i32
  }
  func.func @transform_4(%arg0: i32) -> (i32, i32) {
    %c0_i32 = arith.constant 0 : i32
    %c0_i32_0 = arith.constant 0 : i32
    return %arg0, %c0_i32 : i32, i32
  }
}

</mosaic_0001>

<bundles_post_ra>
// kernel: slew_rate_cost.1
= control target key start
LH: loop header
LB: loop body
LE: loop exit
PB: predicated region body
PF: predicated region fallthrough
CT: control target
= control target key end

     0   :  { %v332_v0 = vmov 3   ;;  %v333_v1 = vmov 1   ;;  %v334_v3 = vmov 4   ;;  %v335_v4 = vmov 2   ;;  %s347_s18 = smov 124   ;;  %s350_s21 = smov 96   ;;  %s497_s0 = inlined_call_operand.vmem [shape: f32[2,16], index: 0, kind: input, shape index: {}]   ;;  %s498_s2 = inlined_call_operand.vmem [shape: f32[2,144], index: 2, kind: input, shape index: {}]   ;;  %s499_s1 = inlined_call_operand.vmem [shape: f32[3,2,256], index: 1, kind: input, shape index: {}]   ;;  %s500_s3 = inlined_call_operand.vmem [shape: f32[2,12], index: 3, kind: input, shape index: {}]   ;;  %s501_s4 = inlined_call_operand.vmem [shape: f32[2,1], index: 4, kind: output, shape index: {}]  }
   0x1   :  { %317 = vset.pattern.permute.xlu1 %v332_v0  ;;  %315 = vset.pattern.permute.xlu0 %v333_v1  ;;  %v393_v2 = vld [vmem:[%s497_s0] sm:$0x3]  ;;  %v336_v5 = vmov 5   ;;  %v337_v6 = vmov 6   ;;  %v338_v7 = vmov 7   ;;  %v339_v8 = vmov 9  }
   0x2   :  { %174 = vperm.xlu1 %317, %v393_v2   ;;  %154 = vperm.xlu0 %315, %v393_v2   ;;  %v340_v9 = vmov 8   ;;  %v341_v10 = vmov 12   ;;  %v342_v11 = vmov 10   ;;  %v343_v12 = vmov 0   ;;  %v412_v15 = vld [vmem:[%s498_s2] sm:$0xf] }
   0x3   :  { %v344_v13 = vmov 11   ;;  %v345_v14 = vmov 15   ;;  %v346_v16 = vmov 14   ;;  %v348_v17 = vmov 13   ;;  %v421_v18 = vld [vmem:[%s499_s1] sm:$0xf] }
   0x4   :  { %s349_s2 = smov 112   ;;  %s351_s22 = smov 80   ;;  %v362_v47 = vmov 1983009808   ;;  %v263_v49 = vlaneseq  ;;  %vm127_vm0 = vcmask 64512   ;;  %vm271_vm1 = vcmask 91136  }
   0x5   :  { %s352_s23 = smov 64   ;;  %s353_s24 = smov 48   ;;  %v261_v48 = vunpack.c.l.s4 %v362_v47  ;;  %vm255_vm2 = vcmask 123904   ;;  %vm276_vm3 = vcmask 1024  }
   0x6   :  { %318 = vset.pattern.permute.xlu1 %v334_v3  ;;  %316 = vset.pattern.permute.xlu0 %v335_v4  ;;  %s354_s1 = smov 116   ;;  %s355_s25 = smov 104   ;;  %v264_v52 = vshrl.u32 %v263_v49, 7 }
   0x7   :  { %24 = vperm.xlu1 %318, %v393_v2   ;;  %164 = vperm.xlu0 %316, %v393_v2   ;;  %s356_s26 = smov 32   ;;  %s357_s27 = smov 92   ;;  %v262_v51 = vunpack.c.0.s8 %v261_v48 }
   0x8   :  { %s358_s28 = smov 16   ;;  %s359_s29 = smov 68  }
   0x9   :  { %s360_s30 = smov 56   ;;  %s361_s5 = smov 44   ;;  %v265_v55 = vsub.s32 %v262_v51, %v264_v52 }
   0xa   :  { %s363_s6 = smov 8   ;;  %s364_s7 = smov 20  }
   0xb   :  { %319 = vset.pattern.permute.xlu1 %v336_v5  ;;  %320 = vset.pattern.permute.xlu0 %v337_v6  ;;  %v266_v56 = vrot.slane %v393_v2, %v265_v55 }
   0xc   :  { %29 = vperm.xlu1 %319, %v393_v2   ;;  %39 = vperm.xlu0 %320, %v393_v2  }
  0x10   :  { %321 = vset.pattern.permute.xlu1 %v338_v7  ;;  %323 = vset.pattern.permute.xlu0 %v339_v8 }
  0x11   :  { %49 = vperm.xlu1 %321, %v393_v2   ;;  %69 = vperm.xlu0 %323, %v393_v2  }
  0x15   :  { %322 = vset.pattern.permute.xlu1 %v340_v9  ;;  %326 = vset.pattern.permute.xlu0 %v341_v10 }
  0x16   :  { %59 = vperm.xlu1 %322, %v393_v2   ;;  %99 = vperm.xlu0 %326, %v393_v2  }
  0x1a   :  { %324 = vset.pattern.permute.xlu1 %v342_v11  ;;  %329 = vset.pattern.permute.xlu0 %v343_v12 }
  0x1b   :  { %79 = vperm.xlu1 %324, %v393_v2   ;;  %149 = vperm.xlu0 %329, %v393_v2  }
  0x1f   :  { %325 = vset.pattern.permute.xlu1 %v344_v13  ;;  %330 = vset.pattern.permute.xlu0 %v345_v14 }
  0x20   :  { %89 = vperm.xlu1 %325, %v393_v2   ;;  %132 = vperm.xlu0 %330, %v393_v2  }
  0x24   :  { %327 = vset.pattern.permute.xlu1 %v346_v16  ;;  %136 = vrot.lane.b32.xlu0 %v412_v15, %s347_s18 }
  0x25   :  { %119 = vperm.xlu1 %327, %v393_v2   ;;  %331 = vset.pattern.permute.xlu0 %v332_v0 }
  0x29   :  { %328 = vset.pattern.permute.xlu1 %v348_v17  ;;  %v208_v17 = vrot.slane %v421_v18, 2 }
  0x2a   :  { %109 = vperm.xlu1 %328, %v393_v2  }
  0x2e   :  { %212 = vrot.lane.b32.xlu1 %v421_v18, %s349_s2 }
  0x32   :  { %218 = vrot.lane.b32.xlu1 %v421_v18, %s350_s21 }
  0x36   :  { %224 = vrot.lane.b32.xlu1 %v421_v18, %s351_s22 }
  0x3a   :  { %230 = vrot.lane.b32.xlu1 %v421_v18, %s352_s23 }
  0x3e   :  { %236 = vrot.lane.b32.xlu1 %v421_v18, %s353_s24 }
  0x7d   :  { %v175_v19 = vpop.permute.xlu1 %174  ;;  %v155_v20 = vpop.permute.xlu0 %154 }
  0x7e   :  { %v177_v21 = vmul.f32 %v175_v19, %v421_v18  ;;  %v157_v22 = vmul.f32 %v155_v20, %v421_v18 }
  0x80   :  { %179 = vrot.lane.b32.xlu0 %v177_v21, %s351_s22  ;;  %159 = vrot.lane.b32.xlu1 %v157_v22, %s349_s2 }
  0x82   :  { %v432_v23 = vpop.permute.xlu1 %24  ;;  %v165_v24 = vpop.permute.xlu0 %164 }
  0x83   :  { %v183_v25 = vmul.f32 %v421_v18, %v432_v23  ;;  %v167_v26 = vmul.f32 %v165_v24, %v421_v18  ;;  %v27_v19 = vmul.f32 %v432_v23, %v412_v15 }
  0x85   :  { %185 = vrot.lane.b32.xlu0 %v183_v25, %s352_s23  ;;  %169 = vrot.lane.b32.xlu1 %v167_v26, %s350_s21 }
  0x87   :  { %v30_v27 = vpop.permute.xlu1 %29  ;;  %v40_v28 = vpop.permute.xlu0 %39 }
  0x88   :  { %v32_v29 = vmul.f32 %v30_v27, %v412_v15  ;;  %v189_v30 = vmul.f32 %v421_v18, %v30_v27  ;;  %v42_v31 = vmul.f32 %v40_v28, %v412_v15  ;;  %v195_v32 = vmul.f32 %v421_v18, %v40_v28 }
  0x8a   :  { %191 = vrot.lane.b32.xlu0 %v189_v30, %s353_s24  ;;  %34 = vrot.lane.b32.xlu1 %v32_v29, %s354_s1 }
  0x8c   :  { %v50_v33 = vpop.permute.xlu1 %49  ;;  %v442_v34 = vpop.permute.xlu0 %69 }
  0x8d   :  { %v52_v35 = vmul.f32 %v50_v33, %v412_v15  ;;  %v201_v36 = vmul.f32 %v421_v18, %v50_v33  ;;  %v72_v38 = vmul.f32 %v442_v34, %v412_v15 }
  0x8e   :  { %44 = vrot.lane.b32.xlu1 %v42_v31, %s355_s25  ;;  %197 = vrot.lane.b32.xlu0 %v195_v32, %s356_s26 }
  0x91   :  { %v446_v37 = vpop.permute.xlu1 %59  ;;  %v450_v39 = vpop.permute.xlu0 %99 }
  0x92   :  { %54 = vrot.lane.b32.xlu1 %v52_v35, %s357_s27  ;;  %203 = vrot.lane.b32.xlu0 %v201_v36, %s358_s28  ;;  %v62_v40 = vmul.f32 %v446_v37, %v412_v15  ;;  %v102_v42 = vmul.f32 %v450_v39, %v412_v15  ;;  %v210_v25 = vmul.f32 %v208_v17, %v446_v37 }
  0x96   :  { %v454_v41 = vpop.permute.xlu1 %79  ;;  %64 = vrot.lane.b32.xlu1 %v62_v40, %s351_s22  ;;  %74 = vrot.lane.b32.xlu0 %v72_v38, %s359_s29  ;;  %v150_v59 = vpop.permute.xlu0 %149 }
  0x97   :  { %v82_v43 = vmul.f32 %v454_v41, %v412_v15  ;;  %v152_v1 = vmul.f32 %v150_v59, %v421_v18 }
  0x9a   :  { %84 = vrot.lane.b32.xlu0 %v82_v43, %s360_s30  ;;  %104 = vrot.lane.b32.xlu1 %v102_v42, %s356_s26 }
  0x9b   :  { %v462_v44 = vpop.permute.xlu1 %89  ;;  %v476_v61 = vpop.permute.xlu0 %132 }
  0x9c   :  { %v92_v45 = vmul.f32 %v462_v44, %v412_v15 }
  0x9e   :  { %94 = vrot.lane.b32.xlu0 %v92_v45, %s361_s5 }
  0x9f   :  { %v137_v63 = vpop.permute.xlu0 %136 }
  0xa0   :  { %v466_v46 = vpop.permute.xlu1 %119 }
  0xa1   :  { %v122_v50 = vmul.f32 %v466_v46, %v412_v15 }
  0xa3   :  { %124 = vrot.lane.b32.xlu0 %v122_v50, %s363_s6 }
  0xa5   :  { %v110_v53 = vpop.permute.xlu1 %109 }
  0xa6   :  { %v112_v54 = vmul.f32 %v110_v53, %v412_v15 }
  0xa7   :  { %248 = vrot.lane.b32.xlu0 %v421_v18, %s358_s28 }
  0xa8   :  { %114 = vrot.lane.b32.xlu1 %v112_v54, %s364_s7 }
  0xa9   :  { %v213_v57 = vpop.permute.xlu1 %212 }
  0xaa   :  { %v214_v20 = vrot.slane %v213_v57, 2  ;;  %v138_v57 = vrot.slane %v137_v63, 2 }
  0xac   :  { %242 = vrot.lane.b32.xlu1 %v421_v18, %s356_s26  ;;  %v216_v29 = vmul.f32 %v214_v20, %v442_v34 }
  0xad   :  { %v219_v58 = vpop.permute.xlu1 %218 }
  0xae   :  { %v220_v26 = vrot.slane %v219_v58, 2 }
  0xb0   :  { %267 = vrot.lane.b32.xlu1 %v266_v56, %s347_s18  ;;  %v222_v18 = vmul.f32 %v220_v26, %v454_v41 }
  0xb1   :  { %v225_v60 = vpop.permute.xlu1 %224 }
  0xb2   :  { %v226_v30 = vrot.slane %v225_v60, 2 }
  0xb4   :  { %v228_v38 = vmul.f32 %v226_v30, %v462_v44 }
  0xb5   :  { %v231_v62 = vpop.permute.xlu1 %230 }
  0xb6   :  { %v232_v36 = vrot.slane %v231_v62, 2 }
  0xb8   :  { %v234_v45 = vmul.f32 %v232_v36, %v450_v39  ;;  %v140_v39 = vmul.f32 %v138_v57, %v476_v61 }
  0xb9   :  { %v237_v0 = vpop.permute.xlu1 %236 }
  0xba   :  { %v238_v40 = vrot.slane %v237_v0, 2 }
  0xbc   :  { %v240_v34 = vmul.f32 %v238_v40, %v110_v53 }
  0xf2   :  { %v160_v3 = vpop.permute.xlu1 %159  ;;  %v180_v4 = vpop.permute.xlu0 %179 }
  0xf3   :  { %v162_v5 = vadd.f32 %v160_v3, %v152_v1 }
  0xf7   :  { %v170_v6 = vpop.permute.xlu1 %169  ;;  %v186_v7 = vpop.permute.xlu0 %185 }
  0xf8   :  { %v172_v8 = vadd.f32 %v170_v6, %v162_v5  ;;  %v143_v5 = vld [vmem:[%s500_s3] sm:$0x3] }
  0xfa   :  { %v182_v9 = vadd.f32 %v180_v4, %v172_v8 }
  0xfc   :  { %v188_v10 = vadd.f32 %v186_v7, %v182_v9  ;;  %v35_v11 = vpop.permute.xlu1 %34  ;;  %v192_v12 = vpop.permute.xlu0 %191 }
  0xfd   :  { %v37_v27 = vadd.f32 %v35_v11, %v27_v19 }
  0xfe   :  { %v194_v13 = vadd.f32 %v192_v12, %v188_v10 }
 0x100   :  { %v45_v14 = vpop.permute.xlu1 %44  ;;  %v198_v16 = vpop.permute.xlu0 %197 }
 0x101   :  { %v200_v21 = vadd.f32 %v198_v16, %v194_v13  ;;  %v47_v31 = vadd.f32 %v45_v14, %v37_v27 }
 0x104   :  { %v55_v22 = vpop.permute.xlu1 %54  ;;  %v204_v24 = vpop.permute.xlu0 %203 }
 0x105   :  { %v206_v28 = vadd.f32 %v204_v24, %v200_v21  ;;  %v57_v15 = vadd.f32 %v55_v22, %v47_v31 }
 0x107   :  { %v211_v32 = vadd.f32 %v210_v25, %v206_v28 }
 0x108   :  { %v65_v33 = vpop.permute.xlu1 %64  ;;  %v75_v35 = vpop.permute.xlu0 %74 }
 0x109   :  { %v217_v23 = vadd.f32 %v216_v29, %v211_v32  ;;  %v67_v37 = vadd.f32 %v65_v33, %v57_v15 }
 0x10b   :  { %v223_v42 = vadd.f32 %v222_v18, %v217_v23  ;;  %v77_v48 = vadd.f32 %v75_v35, %v67_v37 }
 0x10c   :  { %v85_v43 = vpop.permute.xlu0 %84  ;;  %v105_v55 = vpop.permute.xlu1 %104 }
 0x10d   :  { %v229_v47 = vadd.f32 %v228_v38, %v223_v42  ;;  %v87_v52 = vadd.f32 %v85_v43, %v77_v48 }
 0x10f   :  { %v235_v49 = vadd.f32 %v234_v45, %v229_v47 }
 0x110   :  { %v95_v50 = vpop.permute.xlu0 %94 }
 0x111   :  { %v241_v51 = vadd.f32 %v240_v34, %v235_v49  ;;  %v97_v54 = vadd.f32 %v95_v50, %v87_v52 }
 0x113   :  { %v107_v58 = vadd.f32 %v105_v55, %v97_v54 }
 0x115   :  { %v125_v41 = vpop.permute.xlu0 %124 }
 0x116   :  { %v126_v56 = vrot.slane %v125_v41, 2 }
 0x118   :  { %v128_v60 = vsel %vm127_vm0, %v125_v41, %v126_v56 }
 0x119   :  { %v249_v62 = vpop.permute.xlu0 %248 }
 0x11a   :  { %v115_v44 = vpop.permute.xlu1 %114  ;;  %v250_v1 = vrot.slane %v249_v62, 2 }
 0x11b   :  { %v117_v59 = vadd.f32 %v115_v44, %v107_v58 }
 0x11c   :  { %v252_v8 = vmul.f32 %v250_v1, %v476_v61 }
 0x11d   :  { %v130_v0 = vadd.f32 %v128_v60, %v117_v59 }
 0x11e   :  { %v243_v53 = vpop.permute.xlu1 %242 }
 0x11f   :  { %v141_v3 = vadd.f32 %v140_v39, %v130_v0  ;;  %v244_v4 = vrot.slane %v243_v53, 2 }
 0x121   :  { %v246_v6 = vmul.f32 %v244_v4, %v466_v46  ;;  %v142_v63 = vmul.f32 0.5, %v141_v3 }
 0x122   :  { %v268_v7 = vpop.permute.xlu1 %267 }
 0x123   :  { %v247_v9 = vadd.f32 %v246_v6, %v241_v51  ;;  %v144_v10 = vadd.f32 %v143_v5, %v142_v63 }
 0x125   :  { %v270_v11 = vmul.f32 %v268_v7, %v144_v10  ;;  %v253_v12 = vadd.f32 %v252_v8, %v247_v9 }
 0x127   :  { %v272_v13 = vsel %vm271_vm1, %v270_v11, 0.0  ;;  %v254_v14 = vmul.f32 %v253_v12, %v393_v2 }
 0x128   :  { %273 = vadd.xlane.f32.xlu1 %v272_v13 }
 0x129   :  { %v256_v16 = vsel %vm255_vm2, %v254_v14, 0.0 }
 0x12a   :  { %257 = vadd.xlane.f32.xlu0 %v256_v16 }
 0x1b1   :  { %v274_v20 = vpop.xlane.xlu1 %273 }
 0x1b3   :  { %v258_v17 = vpop.xlane.xlu0 %257 }
 0x1b4   :  { %v259_v19 = vmul.f32 0.5, %v258_v17 }
 0x1b6   :  { %v275_v46 = vadd.f32 %v274_v20, %v259_v19 }
 0x1b8   :  { %277 = vst.msk [vmem:[%s501_s4] sm:$0x3] %vm276_vm3, %v275_v46 }

</bundles_post_ra>
